<compile_context>
chip_gen: v7x
topology: tpu7x:2x2x1
jax: 0.10.0
libtpu: 0.0.40
codegen_flags: <defaults>
</compile_context>

<pallas_src>
import functools

import jax
import jax.numpy as jnp
from jax.experimental import pallas as pl
from jax.experimental.pallas import tpu as pltpu

N_BINS = 15  # _ECELoss default


# ---------------------------------------------------------------------------
# Kernel 1: temperature scaling  (logits * (1/T)), tiled + lane-dense output
# ---------------------------------------------------------------------------
def _scale_kernel(temp_ref, x_ref, o_ref):
    inv_t = 1.0 / temp_ref[0, 0]                      # exact scalar reciprocal
    o_ref[...] = (x_ref[...] * inv_t).astype(o_ref.dtype)


def _lane_dense_view(n, c):
    """Largest (rows, lanes) 2-D factorization with lanes a multiple of 128."""
    total = n * c
    for lane in (2048, 1024, 512, 256, 128):
        if total % lane == 0:
            return (total // lane, lane)
    return None


def _pick_tile_rows(rows, cols, budget_bytes=4 * 1024 * 1024):
    # Keep (tile x cols x 4B) x 2 double-buffers (in + out) comfortably under
    # the smallest scoped-VMEM default (v5e: 16 MiB) and v7x's 64 MiB VMEM.
    max_rows = max(1, budget_bytes // (4 * max(cols, 1)))
    tile = min(rows, 1024, max_rows)
    if tile < rows:
        tile = max(8, (tile // 8) * 8)
    return tile


def temperature_scale(logits, temperature):
    n, c = logits.shape
    temp = jnp.reshape(jnp.asarray(temperature, dtype=jnp.float32), (1, 1))

    flat = _lane_dense_view(n, c)
    x = logits.reshape(flat) if flat is not None else logits
    rows, cols = x.shape
    tile = _pick_tile_rows(rows, cols)
    grid = (pl.cdiv(rows, tile),)

    out = pl.pallas_call(
        _scale_kernel,
        out_shape=jax.ShapeDtypeStruct((rows, cols), logits.dtype),
        grid=grid,
        in_specs=[
            pl.BlockSpec(memory_space=pltpu.MemorySpace.SMEM),   # temperature
            pl.BlockSpec((tile, cols), lambda i: (i, 0)),        # logits tile
        ],
        out_specs=pl.BlockSpec((tile, cols), lambda i: (i, 0)),
        compiler_params=pltpu.CompilerParams(dimension_semantics=("parallel",)),
    )(temp, x)
    return out.reshape(n, c)


# ---------------------------------------------------------------------------
# Kernel 2: fused (NLL, ECE) over temperature-scaled logits, single HBM pass
# ---------------------------------------------------------------------------
def _fused_loss_kernel(n_total, temp_ref, logits_ref, labels_ref,
                       nll_ref, ece_ref,
                       nll_sc, cnt_sc, conf_sc, acc_sc):
    pid = pl.program_id(0)

    @pl.when(pid == 0)
    def _init():
        nll_sc[...] = jnp.zeros_like(nll_sc)
        cnt_sc[...] = jnp.zeros_like(cnt_sc)
        conf_sc[...] = jnp.zeros_like(conf_sc)
        acc_sc[...] = jnp.zeros_like(acc_sc)

    inv_t = 1.0 / temp_ref[0, 0]                        # exact scalar 1/T
    x = logits_ref[...].astype(jnp.float32) * inv_t     # (T, C) scaled, f32
    labels = labels_ref[...]                            # (T, 1) int32
    t, c = x.shape
    valid = (labels >= 0).astype(jnp.float32)           # mask padded rows

    # Shared softmax intermediates (one exp pass feeds both NLL and ECE).
    m = jnp.max(x, axis=1, keepdims=True)               # (T, 1)
    e = jnp.exp(x - m)                                  # (T, C)
    s = jnp.sum(e, axis=1, keepdims=True)               # (T, 1)
    lse = jnp.log(s) + m                                # (T, 1)

    # --- NLL partial sum ---
    cls = jax.lax.broadcasted_iota(jnp.int32, (t, c), 1)
    onehot = (cls == labels).astype(jnp.float32)
    picked = jnp.sum(x * onehot, axis=1, keepdims=True)
    nll_sc[...] += jnp.sum((lse - picked) * valid, axis=0, keepdims=True)

    # --- ECE partial histogram (single-pass binning) ---
    conf = 1.0 / s                                       # max softmax = exp(0)/s
    pred = jnp.min(jnp.where(x == m, cls, c), axis=1, keepdims=True)
    acc = (pred == labels).astype(jnp.float32)           # (T, 1)

    # bins are (k/15, (k+1)/15]  =>  bin = clip(ceil(conf*15) - 1, 0, 14)
    bin_idx = jnp.clip(jnp.ceil(conf * N_BINS) - 1.0, 0.0,
                       N_BINS - 1).astype(jnp.int32)     # (T, 1)
    bins = jax.lax.broadcasted_iota(jnp.int32, (t, N_BINS), 1)
    in_bin = (bins == bin_idx).astype(jnp.float32) * valid  # (T, N_BINS)

    cnt_sc[...] += jnp.sum(in_bin, axis=0, keepdims=True)
    conf_sc[...] += jnp.sum(in_bin * conf, axis=0, keepdims=True)
    acc_sc[...] += jnp.sum(in_bin * acc, axis=0, keepdims=True)

    @pl.when(pid == pl.num_programs(0) - 1)
    def _finalize():
        n_f = jnp.float32(n_total)
        nll_ref[0, 0] = jnp.sum(nll_sc[...]) / n_f
        cnt = cnt_sc[...]
        prop = cnt / n_f
        denom = jnp.maximum(cnt, 1.0)
        gap = jnp.abs(conf_sc[...] / denom - acc_sc[...] / denom)
        ece_ref[0, 0] = jnp.sum(jnp.where(cnt > 0.0, gap * prop,
                                          jnp.float32(0.0)))


def _pick_loss_tile(n, c, budget_bytes=6 * 1024 * 1024):
    # 2x double-buffered f32 logits tile under budget -> fits v5e's 16 MiB
    # scoped-VMEM default and v7x's 64 MiB physical VMEM with headroom.
    max_rows = max(8, budget_bytes // (2 * 4 * max(c, 1)))
    tile = min(n, 1024, max_rows)
    if tile >= 8:
        tile = (tile // 8) * 8
    return max(tile, 1)


def fused_losses(logits, labels, temperature, tile_n=None):
    """One tiled pass over [N, C] logits -> (mean NLL, ECE) of logits / T."""
    n, c = logits.shape
    temp = jnp.reshape(jnp.asarray(temperature, dtype=jnp.float32), (1, 1))
    if tile_n is None:
        tile_n = _pick_loss_tile(n, c)
    n_pad = int(pl.cdiv(n, tile_n)) * tile_n

    x = logits
    lab = labels.astype(jnp.int32).reshape(n, 1)
    if n_pad != n:
        x = jnp.pad(x, ((0, n_pad - n), (0, 0)))
        lab = jnp.pad(lab, ((0, n_pad - n), (0, 0)), constant_values=-1)

    kernel = functools.partial(_fused_loss_kernel, n)
    nll, ece = pl.pallas_call(
        kernel,
        out_shape=(jax.ShapeDtypeStruct((1, 1), jnp.float32),
                   jax.ShapeDtypeStruct((1, 1), jnp.float32)),
        grid=(n_pad // tile_n,),
        in_specs=[
            pl.BlockSpec(memory_space=pltpu.MemorySpace.SMEM),   # temperature
            pl.BlockSpec((tile_n, c), lambda i: (i, 0)),         # logits tile
            pl.BlockSpec((tile_n, 1), lambda i: (i, 0)),         # labels tile
        ],
        out_specs=(pl.BlockSpec(memory_space=pltpu.MemorySpace.SMEM),
                   pl.BlockSpec(memory_space=pltpu.MemorySpace.SMEM)),
        scratch_shapes=[
            pltpu.VMEM((1, 1), jnp.float32),        # running NLL sum
            pltpu.VMEM((1, N_BINS), jnp.float32),   # per-bin counts
            pltpu.VMEM((1, N_BINS), jnp.float32),   # per-bin confidence sums
            pltpu.VMEM((1, N_BINS), jnp.float32),   # per-bin accuracy sums
        ],
        compiler_params=pltpu.CompilerParams(
            dimension_semantics=("arbitrary",)),
    )(temp, x, lab)
    return nll[0, 0], ece[0, 0]


# ---------------------------------------------------------------------------
# Thin wrapper mirroring the PyTorch module
# ---------------------------------------------------------------------------
class CrossValidationModelWithTemperature:
    def __init__(self):
        # nn.Parameter(torch.ones(1) * 1.5) -> deterministic init
        self.temperature = jnp.array([1.5], dtype=jnp.float32)

    def forward(self, x):
        # The PyTorch module's forward() raises NotImplementedError.
        raise NotImplementedError()

    def temperature_scale(self, logits):
        return temperature_scale(logits, self.temperature)

    def nll_criterion(self, logits, labels):
        nll, _ = fused_losses(logits, labels, jnp.float32(1.0))
        return nll

    def ece_criterion(self, logits, labels):
        _, ece = fused_losses(logits, labels, jnp.float32(1.0))
        return ece

    def scaled_losses(self, logits, labels):
        """NLL & ECE of temperature_scale(logits) in one fused HBM pass."""
        return fused_losses(logits, labels, self.temperature)

    # TODO(synk): LBFGS temperature optimization (optimize_temperature) is a
    # host-side training loop, not a kernel; omitted.


# ---------------------------------------------------------------------------
# Plain-JAX references (PyTorch semantics) for sanity checking
# ---------------------------------------------------------------------------
def _ref_nll(logits, labels, t):
    x = logits.astype(jnp.float32) / t
    lse = jax.scipy.special.logsumexp(x, axis=1)
    picked = jnp.take_along_axis(x, labels[:, None], axis=1)[:, 0]
    return jnp.mean(lse - picked)


def _ref_ece(logits, labels, t):
    x = logits.astype(jnp.float32) / t
    p = jax.nn.softmax(x, axis=1)
    conf = jnp.max(p, axis=1)
    pred = jnp.argmax(p, axis=1)
    acc = (pred == labels).astype(jnp.float32)
    n = logits.shape[0]
    ece = jnp.float32(0.0)
    for i in range(N_BINS):
        lo, hi = i / N_BINS, (i + 1) / N_BINS
        in_bin = jnp.logical_and(conf > lo, conf <= hi).astype(jnp.float32)
        cnt = jnp.sum(in_bin)
        prop = cnt / n
        denom = jnp.maximum(cnt, 1.0)
        acc_in = jnp.sum(acc * in_bin) / denom
        conf_in = jnp.sum(conf * in_bin) / denom
        ece = ece + jnp.where(cnt > 0, jnp.abs(conf_in - acc_in) * prop, 0.0)
    return ece


if __name__ == "__main__":
    key = jax.random.PRNGKey(0)
    k_logits, k_labels, k_logits2, k_labels2 = jax.random.split(key, 4)

    model = CrossValidationModelWithTemperature()

    # --- small case: batch 8, 16 classes ---
    N, C = 8, 16
    logits = jax.random.normal(k_logits, (N, C), dtype=jnp.float32)
    labels = jax.random.randint(k_labels, (N,), 0, C, dtype=jnp.int32)

    scaled = model.temperature_scale(logits)
    nll = model.nll_criterion(scaled, labels)
    ece = model.ece_criterion(scaled, labels)
    nll_f, ece_f = model.scaled_losses(logits, labels)   # fused single pass
    jax.block_until_ready((scaled, nll, ece, nll_f, ece_f))

    assert jnp.allclose(scaled, logits / 1.5, atol=1e-5), "temperature_scale mismatch"
    assert jnp.allclose(nll, _ref_nll(logits, labels, 1.5), atol=1e-4, rtol=1e-4), "NLL mismatch"
    assert jnp.allclose(ece, _ref_ece(logits, labels, 1.5), atol=1e-4, rtol=1e-4), "ECE mismatch"
    assert jnp.allclose(nll_f, nll, atol=1e-5), "fused NLL mismatch"
    assert jnp.allclose(ece_f, ece, atol=1e-5), "fused ECE mismatch"

    # --- non-divisible batch: exercises multi-tile accumulation + row masking ---
    N2 = 21
    logits2 = jax.random.normal(k_logits2, (N2, C), dtype=jnp.float32)
    labels2 = jax.random.randint(k_labels2, (N2,), 0, C, dtype=jnp.int32)
    nll2, ece2 = fused_losses(logits2, labels2, model.temperature, tile_n=8)
    jax.block_until_ready((nll2, ece2))
    assert jnp.allclose(nll2, _ref_nll(logits2, labels2, 1.5), atol=1e-4, rtol=1e-4), "tiled NLL mismatch"
    assert jnp.allclose(ece2, _ref_ece(logits2, labels2, 1.5), atol=1e-4, rtol=1e-4), "tiled ECE mismatch"

    print("KERNEL_OK")
</pallas_src>

<mosaic_0001>
module attributes {stable_mosaic.version = 11 : i64} {
  func.func @_scale_kernel(%arg0: i32, %arg1: memref<1x1xf32, #tpu.memory_space<smem>>, %arg2: memref<1x128xf32, #tpu.memory_space<vmem>>, %arg3: memref<1x128xf32, #tpu.memory_space<vmem>>) attributes {dimension_semantics = [#tpu.dimension_semantics<parallel>], iteration_bounds = array<i64: 1>, scalar_prefetch = 0 : i64, scratch_operands = 0 : i64, tpu.core_type = #tpu.core_type<tc>, window_params = [{transform_indices = @transform_0, window_bounds = array<i64: 1, 1>}, {transform_indices = @transform_1, window_bounds = array<i64: 1, 128>}, {transform_indices = @transform_2, window_bounds = array<i64: 1, 128>}]} {
    %c0 = arith.constant 0 : index
    %c0_0 = arith.constant 0 : index
    %0 = memref.load %arg1[%c0, %c0_0] : memref<1x1xf32, #tpu.memory_space<smem>>
    %cst = arith.constant 1.000000e+00 : f32
    %1 = arith.divf %cst, %0 : f32
    %c0_1 = arith.constant 0 : index
    %c0_2 = arith.constant 0 : index
    %2 = vector.load %arg2[%c0_1, %c0_2] : memref<1x128xf32, #tpu.memory_space<vmem>>, vector<1x128xf32>
    %3 = vector.broadcast %1 : f32 to vector<1x128xf32>
    %4 = arith.mulf %2, %3 : vector<1x128xf32>
    %c0_3 = arith.constant 0 : index
    %c0_4 = arith.constant 0 : index
    %5 = vector.load %arg3[%c0_3, %c0_4] : memref<1x128xf32, #tpu.memory_space<vmem>>, vector<1x128xf32>
    tpu.vector_store %arg3[%c0_3, %c0_4], %4 {strides = array<i32>} : memref<1x128xf32, #tpu.memory_space<vmem>>, vector<1x128xf32>,
    return
  }
  func.func @transform_0(%arg0: i32) -> (i32, i32) {
    %c0_i32 = arith.constant 0 : i32
    %c0_i32_0 = arith.constant 0 : i32
    %c0_i32_1 = arith.constant 0 : i32
    return %c0_i32, %c0_i32_0 : i32, i32
  }
  func.func @transform_1(%arg0: i32) -> (i32, i32) {
    %c0_i32 = arith.constant 0 : i32
    %c0_i32_0 = arith.constant 0 : i32
    return %arg0, %c0_i32 : i32, i32
  }
  func.func @transform_2(%arg0: i32) -> (i32, i32) {
    %c0_i32 = arith.constant 0 : i32
    %c0_i32_0 = arith.constant 0 : i32
    return %arg0, %c0_i32 : i32, i32
  }
}

</mosaic_0001>

<bundles_post_ra>
// kernel: tpu_custom_call.1
= control target key start
LH: loop header
LB: loop body
LE: loop exit
PB: predicated region body
PF: predicated region fallthrough
CT: control target
= control target key end

     0   :  { %s98_s0 = inlined_call_operand.<no memory space> [shape: f32[1,1], index: 0, kind: input, shape index: {}]   ;;  %s99_s1 = inlined_call_operand.vmem [shape: f32[1,128], index: 1, kind: input, shape index: {}]   ;;  %s100_s2 = inlined_call_operand.hbm [shape: f32[1,128], index: 2, kind: output, shape index: {}]  }
   0x1   :  { %v14_v0 = vstv %s98_s0 }
   0x2   :  { %8 = vsyncpa [#allocation4], 0  ;;  %38 = vrcp.f32 %v14_v0  ;;  %v17_v2 = vld [vmem:[%s99_s1] sm:$0x1]  ;;  %s64_s13 = smov [#allocation3]  }
   0x3   :  { %s27_s14 = sshll.u32 %s64_s13, 4  ;;  %s28_s14 = int_to_ptr.vmem [resolvable:$true] %s27_s14 }
   0x4   :  { %s40_s16 = scalar_lea.vmem %s28_s14, 16  ;;  %s44_s17 = scalar_lea.vmem %s28_s14, 32 }
   0x5   :  { %p41_p0 = scmp.ne.s32.totalorder %s28_s14, %s40_s16  ;;  %p45_p1 = scmp.lt.s32.totalorder %s28_s14, %s28_s14 }
   0x6   :  { %p46_p2 = scmp.lt.s32.totalorder %s44_s17, %s40_s16 }
   0x8   :  { %p47_p3 = por %p46_p2, %p45_p1 }
   0xa   :  { %p48_p4 = pnand %p47_p3, %p41_p0 }
   0xc   :  { %v39_v1 = vpop.eup %38 }
   0xd   :  { %35 = vpush %v39_v1 }
  0x3e   :  { %s36_s15 = spop %35 }
  0x3f   :  { %v18_v3 = vstv %s36_s15 }
  0x40   :  { %v19_v4 = vmul.f32 %v18_v3, %v17_v2 }
  0x42   :  { %20 = vst [vmem:[#allocation3] sm:$0x1] %v19_v4 }
  0x43   :  { %51 = shalt.err (!%p48_p4)
}
  0x44   :  { %s52_s19 = scalar_lea.hbm %s100_s2, 16 }
  0x45   :  { %p53_p5 = scmp.ne.s32.totalorder %s100_s2, %s52_s19  ;;  %p56_p6 = scmp.lt.u32.totalorder %s52_s19, %s100_s2 }
  0x47   :  { %p58_p7 = pnand %p56_p6, %p53_p5 }
  0x49   :  { %61 = shalt.err (!%p58_p7)
}
  0x4a   :  { %30 = dma.vmem_to_hbm [thread:$0]  %s28_s14, 16, %s100_s2, [#allocation4]  }
  0x4b   :  { %62 = dma.done.wait [#allocation4], 16  }
  0x4c   :  { %63 = vsyncadd [#allocation4], 4294967280 }
  0x4d   :  { %34 = vsyncpa [#allocation4], 1 }

</bundles_post_ra>
